<compile_context>
chip_gen: v5e
topology: v5e:2x2
jax: 0.10.0
libtpu: 0.0.40
codegen_flags: <defaults>
</compile_context>

<pallas_src>
import jax
import jax.numpy as jnp
from jax.experimental import pallas as pl
from jax.experimental.pallas import tpu as pltpu


def identity(x):
    """Identity.forward: a pure pass-through.  Zero cost — just return x."""
    return x


def _identity_dma_kernel(x_hbm, o_hbm, sem):
    # Single whole-array HBM -> HBM DMA.  No VMEM staging, no vld/vst slots.
    cp = pltpu.make_async_copy(x_hbm, o_hbm, sem)
    cp.start()
    cp.wait()


def identity_pallas(x):
    """Identity that materializes a distinct output buffer via one HBM->HBM DMA.

    Only use this when the caller requires an output buffer distinct from x;
    otherwise prefer `identity(x)` (returns x directly, zero data movement).
    """
    # Scalar / empty tensors: nothing to copy.
    if x.ndim == 0 or x.size == 0:
        return x

    return pl.pallas_call(
        _identity_dma_kernel,
        out_shape=jax.ShapeDtypeStruct(x.shape, x.dtype),
        in_specs=[pl.BlockSpec(memory_space=pl.ANY)],
        out_specs=pl.BlockSpec(memory_space=pl.ANY),
        scratch_shapes=[pltpu.SemaphoreType.DMA(())],
    )(x)


if __name__ == "__main__":
    key = jax.random.PRNGKey(0)

    # Small NCHW input, as the encoder would feed it.
    x = jax.random.normal(key, (2, 4, 16, 16), dtype=jnp.float32)

    # Zero-cost pass-through path (the semantically faithful Identity.forward).
    y_passthrough = identity(x)
    assert y_passthrough is x

    # Pallas path: whole-array HBM->HBM DMA into a fresh output buffer.
    y = jax.block_until_ready(identity_pallas(x))
    assert y.shape == x.shape, (y.shape, x.shape)
    assert y.dtype == x.dtype, (y.dtype, x.dtype)
    assert jnp.array_equal(y, x), "Identity kernel output mismatch (f32)"

    # Awkward (non-128-divisible) shape: the single-DMA path has no tiling
    # constraints, so this needs no special handling.
    x2 = jax.random.normal(jax.random.PRNGKey(0), (3, 5, 7), dtype=jnp.bfloat16)
    y2 = jax.block_until_ready(identity_pallas(x2))
    assert y2.shape == x2.shape and y2.dtype == x2.dtype
    assert jnp.array_equal(y2, x2), "Identity kernel output mismatch (bf16)"

    # Scalar / empty short-circuit.
    s = jnp.float32(3.5)
    assert identity_pallas(s) is s
    e = jnp.zeros((0, 4), jnp.float32)
    assert identity_pallas(e) is e

    print("KERNEL_OK")
</pallas_src>

<mosaic_0001>
module attributes {stable_mosaic.version = 11 : i64} {
  func.func @_identity_dma_kernel(%arg0: memref<2x4x16x16xf32, #tpu.memory_space<any>>, %arg1: memref<2x4x16x16xf32, #tpu.memory_space<any>>, %arg2: memref<!tpu.dma_semaphore, #tpu.memory_space<semaphore_mem>>) attributes {dimension_semantics = [], scalar_prefetch = 0 : i64, scratch_operands = 1 : i64, tpu.core_type = #tpu.core_type<tc>} {
    tpu.enqueue_dma source(%arg0 : memref<2x4x16x16xf32, #tpu.memory_space<any>>) target(%arg1 : memref<2x4x16x16xf32, #tpu.memory_space<any>>) target_semaphore(%arg2 : memref<!tpu.dma_semaphore, #tpu.memory_space<semaphore_mem>>)
    tpu.wait_dma2 semaphore(%arg2 : memref<!tpu.dma_semaphore, #tpu.memory_space<semaphore_mem>>) src(%arg0 : memref<2x4x16x16xf32, #tpu.memory_space<any>>) dst(%arg1 : memref<2x4x16x16xf32, #tpu.memory_space<any>>)
    return
  }
}

</mosaic_0001>

<bundles_post_ra>
// kernel: tpu_custom_call.1
= control target key start
LH: loop header
LB: loop body
LE: loop exit
PB: predicated region body
PF: predicated region fallthrough
CT: control target
= control target key end

     0   :  { %s34_s12 = smov [#allocation2]   ;;  %s35_s13 = smov [#allocation3]   ;;  %s53_s0 = inlined_call_operand.hbm [shape: f32[2,4,16,16], index: 0, kind: input, shape index: {}]   ;;  %s54_s1 = inlined_call_operand.hbm [shape: f32[2,4,16,16], index: 1, kind: output, shape index: {}]  }
   0x1   :  { %s10_s8 = sshll.u32 %s53_s0, 4  ;;  %s12_s11 = sshll.u32 %s54_s1, 4  ;;  %s11_s8 = int_to_ptr.hbm [resolvable:$true] %s10_s8  ;;  %s13_s11 = int_to_ptr.hbm [resolvable:$true] %s12_s11 }
   0x2   :  { %s36_s14 = smov 0  }
   0x3   :  { %16 = dma.general %s11_s8, 2048, %s13_s11, %s34_s12, %s35_s13, [#allocation4], %s36_s14, 0  }
   0x4   :  { %32 = dma.done.wait [#allocation2], 2048 }
   0x5   :  { %33 = vsyncadd [#allocation2], 4294965248 }
   0x6   :  { %22 = vsyncmov [#allocation2] }
   0x9   :  { %s23_s15 = vpop.sfrf %22 }
   0xa   :  { %p28_p0 = scmp.ne.s32.totalorder %s23_s15, 0 }
   0xc   :  { %27 = shalt.err (%p28_p0)  }

</bundles_post_ra>
